<compile_context>
chip_gen: v5e
topology: v5e:2x2
jax: 0.10.0
libtpu: 0.0.40
codegen_flags: <defaults>
</compile_context>

<pallas_src>
import functools

import jax
import jax.numpy as jnp
from jax import lax
from jax.experimental import pallas as pl
from jax.experimental.pallas import tpu as pltpu


def _conv_bn_relu_kernel(p_ref, w_ref, gb_ref, o_ref, *, B, HW, eps):
    """Single fused grid step covering all B batch elements.

    p_ref  : (B, KKC, HW)  im2col patches, lane dim = HW (lane-dense)
    w_ref  : (Cout, KKC)   flattened conv weights, row order (dy, dx, cin)
    gb_ref : (Cout, 2)     BN affine params: column 0 = gamma, column 1 = beta
    o_ref  : (B, Cout, HW) fused ConvBlock output (lane-dense)
    """
    w = w_ref[...]                                              # (Cout, KKC)
    inv_count = 1.0 / float(B * HW)

    # --- conv: one lane-dense MXU matmul per batch element, f32 accumulation ---
    ys = [jnp.dot(w, p_ref[b], preferred_element_type=jnp.float32)   # (Cout, HW)
          for b in range(B)]

    # --- BN batch statistics over (B, H, W) per channel, all f32 ---
    s = ys[0].sum(axis=1, keepdims=True)                        # (Cout, 1)
    for b in range(1, B):
        s = s + ys[b].sum(axis=1, keepdims=True)
    mean = s * inv_count

    d0 = ys[0] - mean
    m2 = (d0 * d0).sum(axis=1, keepdims=True)                   # (Cout, 1)
    for b in range(1, B):
        d = ys[b] - mean
        m2 = m2 + (d * d).sum(axis=1, keepdims=True)
    var = m2 * inv_count                                        # biased variance (BN norm)
    inv_std = lax.rsqrt(var + eps)

    gamma = gb_ref[:, 0:1]                                      # (Cout, 1)
    beta = gb_ref[:, 1:2]                                       # (Cout, 1)
    scale = gamma * inv_std
    shift = beta - mean * scale

    # --- affine + ReLU, lane-dense stores ---
    for b in range(B):
        o_ref[b] = jnp.maximum(ys[b] * scale + shift, 0.0).astype(o_ref.dtype)


def conv_block(x_nchw, w_oihw, gamma, beta, *, eps=1e-5, compute_dtype=jnp.float32):
    """ConvBlock forward: Conv2d(stride=1, pad=K//2, bias=False) + BN(batch stats) + ReLU."""
    B, Cin, H, W = x_nchw.shape
    Cout, _, K, _ = w_oihw.shape
    p = K // 2
    HW = H * W
    KKC = K * K * Cin

    # im2col in the wrapper (cheap XLA pad+slice+stack); NCHW kept, no transposes.
    # At production sizes move this in-kernel to avoid the K*K HBM-read inflation.
    xp = jnp.pad(x_nchw.astype(compute_dtype), ((0, 0), (0, 0), (p, p), (p, p)))
    taps = [xp[:, :, dy:dy + H, dx:dx + W] for dy in range(K) for dx in range(K)]
    patches = jnp.stack(taps, axis=1).reshape(B, KKC, HW)        # (B, K*K*Cin, HW)
    # weights flattened to (Cout, K*K*Cin) with matching (dy, dx, cin) ordering
    w_mat = jnp.transpose(w_oihw.astype(compute_dtype), (0, 2, 3, 1)).reshape(Cout, KKC)
    # BN affine params packed into one tiny constant input
    gb = jnp.stack([gamma.astype(jnp.float32), beta.astype(jnp.float32)], axis=1)  # (Cout, 2)

    out = pl.pallas_call(
        functools.partial(_conv_bn_relu_kernel, B=B, HW=HW, eps=eps),
        out_shape=jax.ShapeDtypeStruct((B, Cout, HW), jnp.float32),
        grid=(1,),
        in_specs=[pl.BlockSpec((B, KKC, HW), lambda i: (0, 0, 0)),
                  pl.BlockSpec((Cout, KKC), lambda i: (0, 0)),
                  pl.BlockSpec((Cout, 2), lambda i: (0, 0))],
        out_specs=pl.BlockSpec((B, Cout, HW), lambda i: (0, 0, 0)),
        compiler_params=pltpu.CompilerParams(
            dimension_semantics=("arbitrary",),
            vmem_limit_bytes=32 * 1024 * 1024),
    )(patches, w_mat, gb)

    return out.reshape(B, Cout, H, W)


def conv_block_ref(x, w, gamma, beta, eps=1e-5):
    """Pure-JAX reference matching the PyTorch ConvBlock forward (training-mode BN)."""
    p = w.shape[-1] // 2
    y = lax.conv_general_dilated(x, w, (1, 1), [(p, p), (p, p)],
                                 dimension_numbers=('NCHW', 'OIHW', 'NCHW'))
    mean = y.mean(axis=(0, 2, 3), keepdims=True)
    var = ((y - mean) ** 2).mean(axis=(0, 2, 3), keepdims=True)
    yhat = (y - mean) / jnp.sqrt(var + eps)
    yhat = yhat * gamma.reshape(1, -1, 1, 1) + beta.reshape(1, -1, 1, 1)
    return jnp.maximum(yhat, 0.0)


if __name__ == "__main__":
    B, Cin, Cout, H, W, K = 2, 4, 8, 16, 16, 3

    key = jax.random.PRNGKey(0)
    kx, kw, kg, kb = jax.random.split(key, 4)
    x = jax.random.normal(kx, (B, Cin, H, W), dtype=jnp.float32)
    w = 0.1 * jax.random.normal(kw, (Cout, Cin, K, K), dtype=jnp.float32)
    # BN affine params (PyTorch init is gamma=1, beta=0; perturb to exercise the path)
    gamma = 1.0 + 0.1 * jax.random.normal(kg, (Cout,), dtype=jnp.float32)
    beta = 0.1 * jax.random.normal(kb, (Cout,), dtype=jnp.float32)

    out = conv_block(x, w, gamma, beta)
    out = jax.block_until_ready(out)

    ref = conv_block_ref(x, w, gamma, beta)
    assert out.shape == (B, Cout, H, W)
    assert jnp.allclose(out, ref, rtol=1e-4, atol=1e-4), \
        f"max abs diff {jnp.max(jnp.abs(out - ref))}"

    print("KERNEL_OK")
</pallas_src>

<mosaic_0001>
module attributes {stable_mosaic.version = 11 : i64} {
  func.func @_conv_bn_relu_kernel(%arg0: i32, %arg1: memref<2x36x256xf32, #tpu.memory_space<vmem>>, %arg2: memref<8x36xf32, #tpu.memory_space<vmem>>, %arg3: memref<8x2xf32, #tpu.memory_space<vmem>>, %arg4: memref<2x8x256xf32, #tpu.memory_space<vmem>>) attributes {dimension_semantics = [#tpu.dimension_semantics<arbitrary>], iteration_bounds = array<i64: 1>, scalar_prefetch = 0 : i64, scratch_operands = 0 : i64, tpu.core_type = #tpu.core_type<tc>, window_params = [{pipeline_mode = #tpu.pipeline_mode<synchronous>, transform_indices = @transform_0, window_bounds = array<i64: 2, 36, 256>}, {pipeline_mode = #tpu.pipeline_mode<synchronous>, transform_indices = @transform_1, window_bounds = array<i64: 8, 36>}, {pipeline_mode = #tpu.pipeline_mode<synchronous>, transform_indices = @transform_2, window_bounds = array<i64: 8, 2>}, {pipeline_mode = #tpu.pipeline_mode<synchronous>, transform_indices = @transform_3, window_bounds = array<i64: 2, 8, 256>}]} {
    %c0 = arith.constant 0 : index
    %c0_0 = arith.constant 0 : index
    %0 = vector.load %arg2[%c0, %c0_0] : memref<8x36xf32, #tpu.memory_space<vmem>>, vector<8x36xf32>
    %c0_1 = arith.constant 0 : index
    %c0_2 = arith.constant 0 : index
    %c0_3 = arith.constant 0 : index
    %1 = vector.load %arg1[%c0_1, %c0_2, %c0_3] : memref<2x36x256xf32, #tpu.memory_space<vmem>>, vector<1x36x256xf32>
    %2 = vector.shape_cast %1 : vector<1x36x256xf32> to vector<36x256xf32>
    %cst = arith.constant dense<0.000000e+00> : vector<8x256xf32>
    %3 = tpu.matmul %0, %2, %cst {dimension_numbers = #tpu.dot_dimension_numbers<[1], [0], [0], [1], [0, 0, 1, 1], [], []>} : vector<8x36xf32>, vector<36x256xf32>, vector<8x256xf32> -> vector<8x256xf32>
    %c1 = arith.constant 1 : index
    %c0_4 = arith.constant 0 : index
    %c0_5 = arith.constant 0 : index
    %4 = vector.load %arg1[%c1, %c0_4, %c0_5] : memref<2x36x256xf32, #tpu.memory_space<vmem>>, vector<1x36x256xf32>
    %5 = vector.shape_cast %4 : vector<1x36x256xf32> to vector<36x256xf32>
    %cst_6 = arith.constant dense<0.000000e+00> : vector<8x256xf32>
    %6 = tpu.matmul %0, %5, %cst_6 {dimension_numbers = #tpu.dot_dimension_numbers<[1], [0], [0], [1], [0, 0, 1, 1], [], []>} : vector<8x36xf32>, vector<36x256xf32>, vector<8x256xf32> -> vector<8x256xf32>
    %cst_7 = arith.constant dense<0.000000e+00> : vector<8xf32>
    %7 = vector.multi_reduction <add>, %3, %cst_7 [1] : vector<8x256xf32> to vector<8xf32>
    %8 = vector.shape_cast %7 : vector<8xf32> to vector<8x1xf32>
    %cst_8 = arith.constant dense<0.000000e+00> : vector<8xf32>
    %9 = vector.multi_reduction <add>, %6, %cst_8 [1] : vector<8x256xf32> to vector<8xf32>
    %10 = vector.shape_cast %9 : vector<8xf32> to vector<8x1xf32>
    %11 = arith.addf %8, %10 : vector<8x1xf32>
    %cst_9 = arith.constant 0.001953125 : f32
    %12 = vector.broadcast %cst_9 : f32 to vector<8x1xf32>
    %13 = arith.mulf %11, %12 : vector<8x1xf32>
    %14 = vector.broadcast %13 : vector<8x1xf32> to vector<8x256xf32>
    %15 = arith.subf %3, %14 : vector<8x256xf32>
    %16 = arith.mulf %15, %15 : vector<8x256xf32>
    %cst_10 = arith.constant dense<0.000000e+00> : vector<8xf32>
    %17 = vector.multi_reduction <add>, %16, %cst_10 [1] : vector<8x256xf32> to vector<8xf32>
    %18 = vector.shape_cast %17 : vector<8xf32> to vector<8x1xf32>
    %19 = vector.broadcast %13 : vector<8x1xf32> to vector<8x256xf32>
    %20 = arith.subf %6, %19 : vector<8x256xf32>
    %21 = arith.mulf %20, %20 : vector<8x256xf32>
    %cst_11 = arith.constant dense<0.000000e+00> : vector<8xf32>
    %22 = vector.multi_reduction <add>, %21, %cst_11 [1] : vector<8x256xf32> to vector<8xf32>
    %23 = vector.shape_cast %22 : vector<8xf32> to vector<8x1xf32>
    %24 = arith.addf %18, %23 : vector<8x1xf32>
    %cst_12 = arith.constant 0.001953125 : f32
    %25 = vector.broadcast %cst_12 : f32 to vector<8x1xf32>
    %26 = arith.mulf %24, %25 : vector<8x1xf32>
    %cst_13 = arith.constant 9.99999974E-6 : f32
    %27 = vector.broadcast %cst_13 : f32 to vector<8x1xf32>
    %28 = arith.addf %26, %27 : vector<8x1xf32>
    %29 = math.rsqrt %28 : vector<8x1xf32>
    %c0_14 = arith.constant 0 : index
    %c0_15 = arith.constant 0 : index
    %30 = vector.load %arg3[%c0_14, %c0_15] : memref<8x2xf32, #tpu.memory_space<vmem>>, vector<8x1xf32>
    %c0_16 = arith.constant 0 : index
    %c1_17 = arith.constant 1 : index
    %31 = vector.load %arg3[%c0_16, %c1_17] : memref<8x2xf32, #tpu.memory_space<vmem>>, vector<8x1xf32>
    %32 = arith.mulf %30, %29 : vector<8x1xf32>
    %33 = arith.mulf %13, %32 : vector<8x1xf32>
    %34 = arith.subf %31, %33 : vector<8x1xf32>
    %35 = vector.broadcast %32 : vector<8x1xf32> to vector<8x256xf32>
    %36 = arith.mulf %3, %35 : vector<8x256xf32>
    %37 = vector.broadcast %34 : vector<8x1xf32> to vector<8x256xf32>
    %38 = arith.addf %36, %37 : vector<8x256xf32>
    %cst_18 = arith.constant 0.000000e+00 : f32
    %39 = vector.broadcast %cst_18 : f32 to vector<8x256xf32>
    %40 = arith.maximumf %38, %39 : vector<8x256xf32>
    %c0_19 = arith.constant 0 : index
    %c0_20 = arith.constant 0 : index
    %c0_21 = arith.constant 0 : index
    %41 = vector.load %arg4[%c0_19, %c0_20, %c0_21] : memref<2x8x256xf32, #tpu.memory_space<vmem>>, vector<1x8x256xf32>
    %42 = vector.shape_cast %41 : vector<1x8x256xf32> to vector<8x256xf32>
    %43 = vector.shape_cast %40 : vector<8x256xf32> to vector<1x8x256xf32>
    tpu.vector_store %arg4[%c0_19, %c0_20, %c0_21], %43 {strides = array<i32>} : memref<2x8x256xf32, #tpu.memory_space<vmem>>, vector<1x8x256xf32>,
    %44 = vector.broadcast %32 : vector<8x1xf32> to vector<8x256xf32>
    %45 = arith.mulf %6, %44 : vector<8x256xf32>
    %46 = vector.broadcast %34 : vector<8x1xf32> to vector<8x256xf32>
    %47 = arith.addf %45, %46 : vector<8x256xf32>
    %cst_22 = arith.constant 0.000000e+00 : f32
    %48 = vector.broadcast %cst_22 : f32 to vector<8x256xf32>
    %49 = arith.maximumf %47, %48 : vector<8x256xf32>
    %c1_23 = arith.constant 1 : index
    %c0_24 = arith.constant 0 : index
    %c0_25 = arith.constant 0 : index
    %50 = vector.load %arg4[%c1_23, %c0_24, %c0_25] : memref<2x8x256xf32, #tpu.memory_space<vmem>>, vector<1x8x256xf32>
    %51 = vector.shape_cast %50 : vector<1x8x256xf32> to vector<8x256xf32>
    %52 = vector.shape_cast %49 : vector<8x256xf32> to vector<1x8x256xf32>
    tpu.vector_store %arg4[%c1_23, %c0_24, %c0_25], %52 {strides = array<i32>} : memref<2x8x256xf32, #tpu.memory_space<vmem>>, vector<1x8x256xf32>,
    return
  }
  func.func @transform_0(%arg0: i32) -> (i32, i32, i32) {
    %c0_i32 = arith.constant 0 : i32
    %c0_i32_0 = arith.constant 0 : i32
    %c0_i32_1 = arith.constant 0 : i32
    %c0_i32_2 = arith.constant 0 : i32
    return %c0_i32, %c0_i32_0, %c0_i32_1 : i32, i32, i32
  }
  func.func @transform_1(%arg0: i32) -> (i32, i32) {
    %c0_i32 = arith.constant 0 : i32
    %c0_i32_0 = arith.constant 0 : i32
    %c0_i32_1 = arith.constant 0 : i32
    return %c0_i32, %c0_i32_0 : i32, i32
  }
  func.func @transform_2(%arg0: i32) -> (i32, i32) {
    %c0_i32 = arith.constant 0 : i32
    %c0_i32_0 = arith.constant 0 : i32
    %c0_i32_1 = arith.constant 0 : i32
    return %c0_i32, %c0_i32_0 : i32, i32
  }
  func.func @transform_3(%arg0: i32) -> (i32, i32, i32) {
    %c0_i32 = arith.constant 0 : i32
    %c0_i32_0 = arith.constant 0 : i32
    %c0_i32_1 = arith.constant 0 : i32
    %c0_i32_2 = arith.constant 0 : i32
    return %c0_i32, %c0_i32_0, %c0_i32_1 : i32, i32, i32
  }
}

</mosaic_0001>

<bundles_post_ra>
// kernel: tpu_custom_call.1
= control target key start
LH: loop header
LB: loop body
LE: loop exit
PB: predicated region body
PF: predicated region fallthrough
CT: control target
= control target key end

     0   :  { %vm30_vm0 = vcmask 1043456   ;;  %vm26_vm1 = vcmask 293888   ;;  %s371_s0 = inlined_call_operand.vmem [shape: f32[2,36,256], index: 0, kind: input, shape index: {}]   ;;  %s372_s1 = inlined_call_operand.vmem [shape: f32[8,36], index: 1, kind: input, shape index: {}]   ;;  %s373_s2 = inlined_call_operand.vmem [shape: f32[8,2], index: 2, kind: input, shape index: {}]   ;;  %s374_s3 = inlined_call_operand.hbm [shape: f32[2,8,256], index: 3, kind: output, shape index: {}]  }
   0x1   :  { %v24_v0 = vld [vmem:[%s371_s0 + $0x40] sm:$0xf]  ;;  %v25_v1 = vld [vmem:[%s371_s0 + $0x48] sm:$0xf]  ;;  %v22_v2 = vld [vmem:[%s371_s0 + $0x30] sm:$0xff] }
   0x2   :  { %222 = vmatpush.msk.msra.mxu0 %vm30_vm0, %v24_v0  ;;  %224 = vmatpush.msk.msra.mxu1 %vm30_vm0, %v25_v1  ;;  %v23_v3 = vld [vmem:[%s371_s0 + $0x38] sm:$0xff]  ;;  %v234_v4 = vld [vmem:[%s371_s0 + $0x90] sm:$0xf]  ;;  %v20_v6 = vld [vmem:[%s371_s0 + $0x20] sm:$0xff] }
   0x3   :  { %v235_v5 = vld [vmem:[%s371_s0 + $0x98] sm:$0xf]  ;;  %236 = vmatpush.msk.msra.mxu2 %vm30_vm0, %v234_v4  ;;  %v21_v7 = vld [vmem:[%s371_s0 + $0x28] sm:$0xff]  ;;  %v232_v8 = vld [vmem:[%s371_s0 + $0x80] sm:$0xff] }
   0x4   :  { %238 = vmatpush.msk.msra.mxu3 %vm30_vm0, %v235_v5  ;;  %49 = vmatpush.msra.mxu0 %v22_v2  ;;  %v233_v9 = vld [vmem:[%s371_s0 + $0x88] sm:$0xff]  ;;  %v18_v10 = vld [vmem:[%s371_s0 + $0x10] sm:$0xff]  ;;  %v19_v11 = vld [vmem:[%s371_s0 + $0x18] sm:$0xff] }
   0x5   :  { %69 = vmatpush.msra.mxu1 %v23_v3  ;;  %106 = vmatpush.msra.mxu2 %v232_v8  ;;  %v230_v12 = vld [vmem:[%s371_s0 + $0x70] sm:$0xff]  ;;  %v231_v13 = vld [vmem:[%s371_s0 + $0x78] sm:$0xff]  ;;  %v228_v14 = vld [vmem:[%s371_s0 + $0x60] sm:$0xff] }
   0x6   :  { %126 = vmatpush.msra.mxu3 %v233_v9  ;;  %50 = vmatpush.msra.mxu0 %v20_v6  ;;  %v229_v15 = vld [vmem:[%s371_s0 + $0x68] sm:$0xff]  ;;  %v16_v16 = vld [vmem:[%s371_s0] sm:$0xff] }
   0x7   :  { %70 = vmatpush.msra.mxu1 %v21_v7  ;;  %107 = vmatpush.msra.mxu2 %v230_v12  ;;  %v17_v17 = vld [vmem:[%s371_s0 + $0x8] sm:$0xff]  ;;  %v15_v18 = vld [vmem:[%s372_s1] sm:$0xff] }
   0x8   :  { %127 = vmatpush.msra.mxu3 %v231_v13  ;;  %51 = vmatpush.msra.mxu0 %v18_v10 }
   0x9   :  { %71 = vmatpush.msra.mxu1 %v19_v11 }
   0xa   :  { %8 = vsyncpa [#allocation3], 0  ;;  %108 = vmatpush.msra.mxu2 %v228_v14  ;;  %128 = vmatpush.msra.mxu3 %v229_v15  ;;  %v226_v19 = vld [vmem:[%s371_s0 + $0x50] sm:$0xff]  ;;  %v227_v20 = vld [vmem:[%s371_s0 + $0x58] sm:$0xff]  ;;  %v276_v42 = vmov 0   ;;  %s277_s27 = smov 1  }
   0xb   :  { %52 = vmatpush.msra.mxu0 %v16_v16  ;;  %72 = vmatpush.msra.mxu1 %v17_v17  ;;  %v169_v53 = vld [vmem:[%s373_s2] sm:$0xff]  ;;  %v278_v57 = vmov 1   ;;  %s279_s2 = smov [#allocation2]   ;;  %s210_s4 = sshll.u32 %s374_s3, 4  ;;  %s211_s4 = int_to_ptr.hbm [resolvable:$true] %s210_s4 }
   0xc   :  { %223 = vmatmul.msk.f32.vlgmr.msra.gmra.mxu0 %vm26_vm1, %v15_v18  ;;  %225 = vmatmul.msk.f32.vlgmr.msra.gmra.mxu1 %vm26_vm1, %v15_v18  ;;  %s208_s28 = sshll.u32 %s279_s2, 4  ;;  %s280_s5 = smov 256   ;;  %s209_s28 = int_to_ptr.vmem [resolvable:$true] %s208_s28 }
   0xd   :  { %109 = vmatpush.msra.mxu2 %v226_v19  ;;  %129 = vmatpush.msra.mxu3 %v227_v20  ;;  %s281_s6 = smov 16  }
   0xe   :  { %237 = vmatmul.msk.f32.vlgmr.msra.gmra.mxu2 %vm26_vm1, %v15_v18  ;;  %239 = vmatmul.msk.f32.vlgmr.msra.gmra.mxu3 %vm26_vm1, %v15_v18 }
   0xf   :  { %246 = vset.pattern.permute.xlu2 %v276_v42  ;;  %247 = vset.pattern.permute.xlu0 %v278_v57 }
  0x89   :  { %v54_v21 = vpop.f32.mrf.mxu0  ;;  %v74_v22 = vpop.f32.mrf.mxu1 }
  0x8a   :  { %v134_v23 = vadd.f32 %v74_v22, %v54_v21 }
  0x8c   :  { %135 = vadd.xlane.f32.xlu0 %v134_v23 }
  0x91   :  { %v111_v24 = vpop.f32.mrf.mxu2  ;;  %v131_v25 = vpop.f32.mrf.mxu3 }
  0x92   :  { %v137_v26 = vadd.f32 %v131_v25, %v111_v24 }
  0x94   :  { %138 = vadd.xlane.f32.xlu0 %v137_v26 }
  0xff   :  { %v136_v27 = vpop.xlane.xlu0 %135 }
 0x107   :  { %v139_v28 = vpop.xlane.xlu0 %138 }
 0x108   :  { %v140_v29 = vadd.f32 %v139_v28, %v136_v27 }
 0x10a   :  { %v141_v30 = vmul.f32 0.001953125, %v140_v29 }
 0x10c   :  { %v142_v31 = vsub.f32 %v54_v21, %v141_v30  ;;  %v143_v32 = vsub.f32 %v74_v22, %v141_v30  ;;  %v149_v36 = vsub.f32 %v111_v24, %v141_v30  ;;  %v150_v37 = vsub.f32 %v131_v25, %v141_v30 }
 0x10e   :  { %v144_v33 = vmul.f32 %v142_v31, %v142_v31  ;;  %v145_v34 = vmul.f32 %v143_v32, %v143_v32  ;;  %v151_v38 = vmul.f32 %v149_v36, %v149_v36  ;;  %v152_v39 = vmul.f32 %v150_v37, %v150_v37 }
 0x110   :  { %v146_v35 = vadd.f32 %v145_v34, %v144_v33  ;;  %v153_v40 = vadd.f32 %v152_v39, %v151_v38 }
 0x112   :  { %147 = vadd.xlane.f32.xlu1 %v146_v35 }
 0x11a   :  { %154 = vadd.xlane.f32.xlu1 %v153_v40 }
 0x185   :  { %v148_v41 = vpop.xlane.xlu1 %147 }
 0x18d   :  { %v155_v43 = vpop.xlane.xlu1 %154 }
 0x18e   :  { %v156_v44 = vadd.f32 %v155_v43, %v148_v41 }
 0x190   :  { %v157_v45 = vmul.f32 0.001953125, %v156_v44 }
 0x192   :  { %v158_v46 = vadd.f32 1e-05, %v157_v45 }
 0x194   :  { %248 = vrsqrt.f32 %v158_v46  ;;  %vm165_vm3 = vweird.f32 %v158_v46 }
 0x19a   :  { %v249_v47 = vpop.eup %248 }
 0x19b   :  { %v160_v48 = vmul.f32 %v249_v47, %v158_v46  ;;  %vm166_vm2 = vweird.f32 %v249_v47 }
 0x19c   :  { %vm167_vm4 = vmor %vm165_vm3, %vm166_vm2 }
 0x19d   :  { %v161_v49 = vmul.f32 %v249_v47, %v160_v48 }
 0x19f   :  { %v162_v50 = vmul.f32 0.5, %v161_v49 }
 0x1a1   :  { %v163_v51 = vsub.f32 1.5, %v162_v50 }
 0x1a3   :  { %v164_v52 = vmul.f32 %v249_v47, %v163_v51 }
 0x1a5   :  { %v168_v54 = vsel %vm167_vm4, %v249_v47, %v164_v52 }
 0x1a6   :  { %v170_v55 = vmul.f32 %v169_v53, %v168_v54 }
 0x1a8   :  { %v171_v56 = vmul.f32 %v170_v55, %v141_v30 }
 0x1aa   :  { %173 = vrot.lane.b32.xlu2 %v171_v56, %s277_s27 }
 0x1b2   :  { %179 = vperm.xlu2 %246, %v170_v55  }
 0x204   :  { %v174_v58 = vpop.permute.xlu2 %173 }
 0x205   :  { %v176_v59 = vsub.f32 %v169_v53, %v174_v58 }
 0x207   :  { %186 = vperm.xlu0 %247, %v176_v59  }
 0x20c   :  { %v180_v60 = vpop.permute.xlu2 %179 }
 0x20d   :  { %v182_v61 = vmul.f32 %v180_v60, %v54_v21  ;;  %v183_v62 = vmul.f32 %v180_v60, %v74_v22  ;;  %v195_v63 = vmul.f32 %v180_v60, %v111_v24  ;;  %v196_v0 = vmul.f32 %v180_v60, %v131_v25 }
 0x279   :  { %v187_v1 = vpop.permute.xlu0 %186 }
 0x27a   :  { %v189_v2 = vadd.f32 %v187_v1, %v182_v61  ;;  %v190_v3 = vadd.f32 %v187_v1, %v183_v62  ;;  %v197_v4 = vadd.f32 %v195_v63, %v187_v1  ;;  %v198_v5 = vadd.f32 %v196_v0, %v187_v1 }
 0x27c   :  { %v191_v6 = vmax.f32 %v189_v2, 0.0  ;;  %v192_v7 = vmax.f32 %v190_v3, 0.0  ;;  %v199_v8 = vmax.f32 %v197_v4, 0.0  ;;  %v200_v9 = vmax.f32 %v198_v5, 0.0 }
 0x27e   :  { %193 = vst [vmem:[#allocation2] sm:$0xff] %v191_v6 }
 0x27f   :  { %194 = vst [vmem:[#allocation2 + $0x8] sm:$0xff] %v192_v7 }
 0x280   :  { %202 = vst [vmem:[#allocation2 + $0x10] sm:$0xff] %v199_v8 }
 0x281   :  { %203 = vst [vmem:[#allocation2 + $0x18] sm:$0xff] %v200_v9 }
 0x282   :  { %216 = dma.vmem_to_hbm [thread:$0]  %s209_s28, 512, %s211_s4, [#allocation3], %s280_s5, %s280_s5, %s281_s6  }
 0x283   :  { %274 = dma.done.wait [#allocation3], 512  }
 0x284   :  { %275 = vsyncadd [#allocation3], 4294966784 }
 0x285   :  { %221 = vsyncpa [#allocation3], 1 }

</bundles_post_ra>
